<compile_context>
chip_gen: v7x
topology: tpu7x:2x2x1
jax: 0.10.0
libtpu: 0.0.40
codegen_flags: <defaults>
</compile_context>

<pallas_src>
import jax
import jax.numpy as jnp
from jax.experimental import pallas as pl
from jax.experimental.pallas import tpu as pltpu


def _routing_kernel(x_ref, w_ref, b_ref, o_ref):
    # x_ref: (B, C)  w_ref: (C, E)  b_ref: (1, E)  o_ref: (B, E)
    acc = jnp.dot(x_ref[...], w_ref[...], preferred_element_type=jnp.float32)
    acc = acc + b_ref[...]                      # (1,E) sublane-broadcast
    # sigmoid = 1 / (1 + exp(-x)); exp and approx-reciprocal both land on the
    # EUP slot, leaving the VALU slots free.
    o_ref[...] = pl.reciprocal(1.0 + jnp.exp(-acc), approx=True).astype(o_ref.dtype)


def prepare_routing_params(weight, bias, dtype=jnp.float32):
    """One-time layout/cast of the nn.Linear parameters.

    weight: (num_experts, in_channels)  -- PyTorch nn.Linear layout.
    bias:   (num_experts,)
    Returns (w_t, b2) with w_t: (in_channels, num_experts), b2: (1, num_experts),
    already cast, so the per-call hot path emits no transpose/convert ops.
    For very large in_channels pass dtype=jnp.bfloat16 to halve weight DMA bytes
    (accumulation stays f32 via preferred_element_type).
    """
    num_experts, in_channels = weight.shape
    w_t = jnp.asarray(weight, dtype=dtype).T                      # (C, E)
    b2 = jnp.reshape(jnp.asarray(bias, dtype=jnp.float32), (1, num_experts))
    return w_t, b2


def routing_forward_batched(x, w_t, b2):
    """Batched routing: x is (B, ...) with each sample flattening to in_channels.

    Returns sigmoid(fc(dropout(flatten(x_i)))) for each sample i, shape (B, E).
    Dropout is the identity (eval mode).
    """
    in_channels, num_experts = w_t.shape
    batch = x.shape[0]
    x_flat = jnp.reshape(x, (batch, in_channels)).astype(w_t.dtype)

    # Pad the batch to a multiple of 8 sublanes for an aligned VMEM slab.
    batch_pad = ((batch + 7) // 8) * 8
    if batch_pad != batch:
        x_flat = jnp.pad(x_flat, ((0, batch_pad - batch), (0, 0)))

    out = pl.pallas_call(
        _routing_kernel,
        out_shape=jax.ShapeDtypeStruct((batch_pad, num_experts), jnp.float32),
        in_specs=[
            pl.BlockSpec(memory_space=pltpu.VMEM),
            pl.BlockSpec(memory_space=pltpu.VMEM),
            pl.BlockSpec(memory_space=pltpu.VMEM),
        ],
        out_specs=pl.BlockSpec(memory_space=pltpu.VMEM),
    )(x_flat, w_t, b2)
    return out[:batch]


def routing_forward(x, w_t, b2):
    """Single-sample path matching the PyTorch module exactly:
    flattens the WHOLE tensor to (in_channels,) and returns (num_experts,)."""
    # TODO(synk): training-mode dropout (random mask + 1/(1-p) scale) is omitted;
    # at inference nn.Dropout is the identity.
    out = routing_forward_batched(jnp.reshape(x, (1, -1)), w_t, b2)
    return jnp.reshape(out, (w_t.shape[1],))


if __name__ == "__main__":
    # Small deterministic setup consistent with the module:
    # in_channels = 32 (a pooled (4, 2, 2, 2) feature map flattens to 32),
    # num_experts = 8, dropout_rate = 0.2 (identity at inference).
    in_channels = 32
    num_experts = 8
    batch = 8  # batched routing over 8 samples in one pallas_call

    key = jax.random.PRNGKey(0)
    kx, kw, kb = jax.random.split(key, 3)

    x = jax.random.normal(kx, (batch, 4, 2, 2, 2), dtype=jnp.float32)  # per-sample flatten -> 32
    bound = 1.0 / jnp.sqrt(jnp.float32(in_channels))
    weight = jax.random.uniform(
        kw, (num_experts, in_channels), dtype=jnp.float32, minval=-bound, maxval=bound
    )
    bias = jax.random.uniform(
        kb, (num_experts,), dtype=jnp.float32, minval=-bound, maxval=bound
    )

    # One-time parameter layout (hoisted out of the hot path).
    w_t, b2 = prepare_routing_params(weight, bias)

    fwd = jax.jit(routing_forward_batched)
    out = fwd(x, w_t, b2)                       # (batch, num_experts)
    jax.block_until_ready(out)

    # Pure-JAX reference check (approx reciprocal -> slightly looser tolerance).
    ref = jax.nn.sigmoid(jnp.reshape(x, (batch, -1)) @ weight.T + bias)
    assert jnp.allclose(out, ref, atol=5e-3, rtol=5e-3), (out, ref)

    # Single-sample path matching the original module's torch.flatten semantics.
    out1 = routing_forward(x[0], w_t, b2)
    jax.block_until_ready(out1)
    ref1 = jax.nn.sigmoid(jnp.reshape(x[0], (-1,)) @ weight.T + bias)
    assert jnp.allclose(out1, ref1, atol=5e-3, rtol=5e-3), (out1, ref1)

    print("KERNEL_OK")
</pallas_src>

<mosaic_0001>
module attributes {stable_mosaic.version = 11 : i64} {
  func.func @_routing_kernel(%arg0: memref<8x32xf32, #tpu.memory_space<vmem>>, %arg1: memref<32x8xf32, #tpu.memory_space<vmem>>, %arg2: memref<1x8xf32, #tpu.memory_space<vmem>>, %arg3: memref<8x8xf32, #tpu.memory_space<vmem>>) attributes {dimension_semantics = [], scalar_prefetch = 0 : i64, scratch_operands = 0 : i64, tpu.core_type = #tpu.core_type<tc>} {
    %c0 = arith.constant 0 : index
    %c0_0 = arith.constant 0 : index
    %0 = vector.load %arg0[%c0, %c0_0] : memref<8x32xf32, #tpu.memory_space<vmem>>, vector<8x32xf32>
    %c0_1 = arith.constant 0 : index
    %c0_2 = arith.constant 0 : index
    %1 = vector.load %arg1[%c0_1, %c0_2] : memref<32x8xf32, #tpu.memory_space<vmem>>, vector<32x8xf32>
    %cst = arith.constant dense<0.000000e+00> : vector<8x8xf32>
    %2 = tpu.matmul %0, %1, %cst {dimension_numbers = #tpu.dot_dimension_numbers<[1], [0], [0], [1], [0, 0, 1, 1], [], []>} : vector<8x32xf32>, vector<32x8xf32>, vector<8x8xf32> -> vector<8x8xf32>
    %c0_3 = arith.constant 0 : index
    %c0_4 = arith.constant 0 : index
    %3 = vector.load %arg2[%c0_3, %c0_4] : memref<1x8xf32, #tpu.memory_space<vmem>>, vector<1x8xf32>
    %4 = vector.broadcast %3 : vector<1x8xf32> to vector<8x8xf32>
    %5 = arith.addf %2, %4 : vector<8x8xf32>
    %cst_5 = arith.constant 0.000000e+00 : f32
    %6 = vector.broadcast %cst_5 : f32 to vector<8x8xf32>
    %7 = arith.subf %6, %5 : vector<8x8xf32>
    %8 = math.exp %7 : vector<8x8xf32>
    %cst_6 = arith.constant 1.000000e+00 : f32
    %9 = vector.broadcast %cst_6 : f32 to vector<8x8xf32>
    %10 = arith.addf %9, %8 : vector<8x8xf32>
    %11 = tpu.reciprocal %10 {approx = true} : vector<8x8xf32> -> vector<8x8xf32>
    %c0_7 = arith.constant 0 : index
    %c0_8 = arith.constant 0 : index
    %12 = vector.load %arg3[%c0_7, %c0_8] : memref<8x8xf32, #tpu.memory_space<vmem>>, vector<8x8xf32>
    tpu.vector_store %arg3[%c0_7, %c0_8], %11 {strides = array<i32>} : memref<8x8xf32, #tpu.memory_space<vmem>>, vector<8x8xf32>,
    return
  }
}

</mosaic_0001>

<bundles_post_ra>
// kernel: routing_forward_batched.1
= control target key start
LH: loop header
LB: loop body
LE: loop exit
PB: predicated region body
PF: predicated region fallthrough
CT: control target
= control target key end

     0   :  { %v178_v3 = vmov 0.0|0.0   ;;  %vm179_vm0 = vmmov 0   ;;  %v180_v6 = vmov 0.0   ;;  %s232_s0 = inlined_call_operand.vmem [shape: f32[8,32], index: 0, kind: input, shape index: {}]   ;;  %s233_s1 = inlined_call_operand.vmem [shape: f32[32,8], index: 1, kind: input, shape index: {}]   ;;  %s234_s2 = inlined_call_operand.vmem [shape: f32[1,8], index: 2, kind: input, shape index: {}]   ;;  %s235_s3 = inlined_call_operand.hbm [shape: f32[8,8], index: 3, kind: output, shape index: {}]  }
   0x1   :  { %v16_v0 = vld [vmem:[%s233_s1] sm:$0xff]  ;;  %v17_v1 = vld [vmem:[%s233_s1 + $0x8] sm:$0xff]  ;;  %v18_v2 = vld [vmem:[%s233_s1 + $0x10] sm:$0xff]  ;;  %140 = vmatprep.subr.bf16.mxu0 %v178_v3  ;;  %137 = vmatprep.mubr.msk.f32.mxu0 %vm179_vm0, %v180_v6 }
   0x2   :  { %v141_v4 = vpack.c.bf16 %v17_v1, %v16_v0  ;;  %v19_v5 = vld [vmem:[%s233_s1 + $0x18] sm:$0xff] }
   0x3   :  { %8 = vsyncpa [#allocation3], 0  ;;  %v144_v7 = vpack.c.bf16 %v19_v5, %v18_v2  ;;  %v15_v8 = vld [vmem:[%s232_s0] sm:$0xff]  ;;  %vm27_vm1 = vcmask 261120   ;;  %s181_s1 = smov [#allocation2]   ;;  %vm106_vm2 = vcmask 64512  }
   0x4   :  { %142 = vmatpush3.bf16.msra.mxu0 %v141_v4  ;;  %v122_v9 = vld [vmem:[%s234_s2] ss:$0 sm:$0xff]  ;;  %s114_s24 = sshll.u32 %s181_s1, 4  ;;  %s115_s24 = int_to_ptr.vmem [resolvable:$true] %s114_s24 }
   0x5   :  { %143 = vmatprep.subr.bf16.mxu0 %v178_v3  ;;  %s154_s0 = scalar_lea.vmem %s115_s24, 128  ;;  %p159_p1 = scmp.lt.s32.totalorder %s115_s24, %s115_s24 }
   0x6   :  { %p155_p0 = scmp.ne.s32.totalorder %s115_s24, %s154_s0  ;;  %p160_p2 = scmp.lt.s32.totalorder %s154_s0, %s154_s0 }
   0x8   :  { %145 = vmatpush3.bf16.msra.mxu0 %v144_v7  ;;  %p161_p3 = por %p160_p2, %p159_p1 }
   0xa   :  { %p162_p4 = pnand %p161_p3, %p155_p0 }
   0xb   :  { %138 = vmatmul.mubr.msk.f32.vlgmr.msra.gmra.mrb[0].mxu0 %vm27_vm1, %v15_v8 }
  0xde   :  { %v97_v10 = vpop.f32.mrb[0].mxu0 }
  0xdf   :  { %v98_v11 = vadd.f32 %v122_v9, %v97_v10  ;;  %v139_v12 = vpop.f32.mrb[1].mxu0 }
  0xe1   :  { %v101_v13 = vsub.f32 0.0, %v98_v11 }
  0xe3   :  { %v102_v14 = vmul.f32 1.442695, %v101_v13 }
  0xe5   :  { %150 = vpow2.f32 %v102_v14 }
  0xef   :  { %v151_v15 = vpop.eup %150 }
  0xf0   :  { %v104_v16 = vadd.f32 1.0, %v151_v15 }
  0xf2   :  { %152 = vrcp.f32 %v104_v16 }
  0xfc   :  { %v153_v17 = vpop.eup %152 }
  0xfd   :  { %107 = vst.msk [vmem:[#allocation2] sm:$0xff] %vm106_vm2, %v153_v17 }
  0xfe   :  { %165 = shalt.err (!%p162_p4)
}
  0xff   :  { %s166_s26 = scalar_lea.hbm %s235_s3, 128 }
 0x100   :  { %p167_p5 = scmp.ne.s32.totalorder %s235_s3, %s166_s26  ;;  %p170_p6 = scmp.lt.u32.totalorder %s166_s26, %s235_s3 }
 0x102   :  { %p172_p7 = pnand %p170_p6, %p167_p5 }
 0x104   :  { %175 = shalt.err (!%p172_p7)
}
 0x105   :  { %117 = dma.vmem_to_hbm [thread:$0]  %s115_s24, 128, %s235_s3, [#allocation3]  }
 0x106   :  { %176 = dma.done.wait [#allocation3], 128  }
 0x107   :  { %177 = vsyncadd [#allocation3], 4294967168 }
 0x108   :  { %121 = vsyncpa [#allocation3], 1 }

</bundles_post_ra>
